<compile_context>
chip_gen: v6e
topology: v6e:2x2x1
jax: 0.10.0
libtpu: 0.0.40
codegen_flags: <defaults>
</compile_context>

<pallas_src>
import functools

import jax
import jax.numpy as jnp
from jax.experimental import pallas as pl
from jax.experimental.pallas import tpu as pltpu

EPS = 1e-5
LANE = 128


# ----------------------------------------------------------------------------- kernel
def _shallow_decoder_kernel(x_ref, w1_ref, b12_ref, w2_ref, w3_ref, b3_ref,
                            o_ref, stats1_ref, stats2_ref,
                            *, batch, tile_rows, num_phases):
    inv_b = 1.0 / batch
    t = pl.program_id(1)
    rows = jax.lax.broadcasted_iota(jnp.int32, (tile_rows, 1), 0)
    valid = (t * tile_rows + rows) < batch      # mask padded batch rows out of stats

    def layer1():
        h = jnp.dot(x_ref[...], w1_ref[...], preferred_element_type=jnp.float32)
        return jnp.maximum(h + b12_ref[0:1, :], 0.0)

    def layer2(n1):
        h = jnp.dot(n1, w2_ref[...], preferred_element_type=jnp.float32)
        return jnp.maximum(h + b12_ref[1:2, :], 0.0)

    def layer3(n2):
        return jnp.dot(n2, w3_ref[...], preferred_element_type=jnp.float32) + b3_ref[...]

    if num_phases == 1:
        # ------- whole batch in one tile: fused pass, exact two-pass variance -------
        h1 = layer1()
        h1m = jnp.where(valid, h1, 0.0)
        mu1 = jnp.sum(h1m, axis=0, keepdims=True) * inv_b
        var1 = jnp.sum(jnp.where(valid, (h1 - mu1) ** 2, 0.0), axis=0, keepdims=True) * inv_b
        n1 = (h1 - mu1) * jax.lax.rsqrt(var1 + EPS)       # affine folded into W2/b2

        h2 = layer2(n1)
        h2m = jnp.where(valid, h2, 0.0)
        mu2 = jnp.sum(h2m, axis=0, keepdims=True) * inv_b
        var2 = jnp.sum(jnp.where(valid, (h2 - mu2) ** 2, 0.0), axis=0, keepdims=True) * inv_b
        n2 = (h2 - mu2) * jax.lax.rsqrt(var2 + EPS)       # affine folded into W3/b3

        o_ref[...] = layer3(n2).astype(o_ref.dtype)
        return

    # ------- multi-tile path: 3 phases, cross-tile BN stats in VMEM scratch -------
    p = pl.program_id(0)

    @pl.when(jnp.logical_and(p == 0, t == 0))
    def _init():
        stats1_ref[...] = jnp.zeros_like(stats1_ref)
        stats2_ref[...] = jnp.zeros_like(stats2_ref)

    h1 = layer1()

    @pl.when(p == 0)
    def _accum_stats1():
        h1m = jnp.where(valid, h1, 0.0)
        stats1_ref[0:1, :] += jnp.sum(h1m, axis=0, keepdims=True)
        stats1_ref[1:2, :] += jnp.sum(h1m * h1m, axis=0, keepdims=True)

    @pl.when(p >= 1)
    def _later_phases():
        mu1 = stats1_ref[0:1, :] * inv_b
        # Clamped one-pass variance: max(.,0)+eps can never feed rsqrt a negative
        # argument.  (Exact two-pass across tiles would need two extra HBM passes.)
        var1 = jnp.maximum(stats1_ref[1:2, :] * inv_b - mu1 * mu1, 0.0)
        n1 = (h1 - mu1) * jax.lax.rsqrt(var1 + EPS)
        h2 = layer2(n1)

        @pl.when(p == 1)
        def _accum_stats2():
            h2m = jnp.where(valid, h2, 0.0)
            stats2_ref[0:1, :] += jnp.sum(h2m, axis=0, keepdims=True)
            stats2_ref[1:2, :] += jnp.sum(h2m * h2m, axis=0, keepdims=True)

        @pl.when(p == num_phases - 1)
        def _finalize():
            mu2 = stats2_ref[0:1, :] * inv_b
            var2 = jnp.maximum(stats2_ref[1:2, :] * inv_b - mu2 * mu2, 0.0)
            n2 = (h2 - mu2) * jax.lax.rsqrt(var2 + EPS)
            o_ref[...] = layer3(n2).astype(o_ref.dtype)


# ----------------------------------------------------------------------------- helpers
def _round_up(x, m):
    return (x + m - 1) // m * m


def _padded_f32_bytes(rows, cols):
    return _round_up(max(rows, 1), 8) * _round_up(max(cols, 1), LANE) * 4


def _vmem_capacity_bytes():
    try:
        cap = getattr(pltpu.get_tpu_info(), "vmem_capacity_bytes", None)
        if cap:
            return int(cap)
    except Exception:
        pass
    return 64 << 20   # conservative default (v7x per-TensorCore VMEM)


def prepare_params(params):
    """Fold BN affine into the following Linear and zero-pad to lane-dense shapes.

    Input params use W^T layout: w1 (n_in, 55), w2 (55, 65), w3 (65, out_dim);
    biases / gamma / beta are (1, features).
    """
    w1, b1, g1, be1, w2, b2, g2, be2, w3, b3 = params
    n_in, h1 = w1.shape
    h2 = w2.shape[1]
    out_dim = w3.shape[1]
    h1p, h2p = _round_up(h1, LANE), _round_up(h2, LANE)
    out_pad = _round_up(out_dim, LANE)
    assert h1p == h2p, "bias packing assumes both hidden dims pad to same lane width"

    # Fold:  y1 @ W2 + b2  with  y1 = n1*g1 + be1   ==>   n1 @ (g1^T * W2) + (be1 @ W2 + b2)
    w2f = g1.reshape(h1, 1) * w2
    b2f = be1.reshape(1, h1) @ w2 + b2.reshape(1, h2)
    w3f = g2.reshape(h2, 1) * w3
    b3f = be2.reshape(1, h2) @ w3 + b3.reshape(1, out_dim)

    w1p = jnp.zeros((n_in, h1p), jnp.float32).at[:, :h1].set(w1)
    w2p = jnp.zeros((h1p, h2p), jnp.float32).at[:h1, :h2].set(w2f)
    w3p = jnp.zeros((h2p, out_pad), jnp.float32).at[:h2, :out_dim].set(w3f)
    b12 = jnp.zeros((2, h1p), jnp.float32)
    b12 = b12.at[0, :h1].set(b1.reshape(h1))
    b12 = b12.at[1, :h2].set(b2f.reshape(h2))
    b3p = jnp.zeros((1, out_pad), jnp.float32).at[0, :out_dim].set(b3f.reshape(out_dim))
    return (w1p, b12, w2p, w3p, b3p)


# ----------------------------------------------------------------------------- wrapper
@functools.partial(jax.jit, static_argnames=("out_dim", "tile_rows"))
def shallow_decoder(x, prepped, out_dim, tile_rows=None):
    # Callers with many independent decoder invocations / time steps should stack
    # them along the batch dim before calling: the tiled kernel handles any B and
    # a fuller M dim keeps the MXU busy and amortizes per-call overhead.
    w1p, b12, w2p, w3p, b3p = prepped
    B, n_in = x.shape
    hp = w1p.shape[1]
    out_pad = w3p.shape[1]

    # ---- batch tiling ----------------------------------------------------------
    if tile_rows is None:
        # ~4 MiB of live per-tile f32 activations, capped at 1024 rows per tile.
        # TODO(synk): for very large outputlayer_size also tile the output-feature dim.
        per_row = 4 * (_round_up(n_in, LANE) + 5 * hp + 2 * out_pad)
        tile_rows = max(8, min(1024, (4 << 20) // per_row // 8 * 8))
    tile_rows = _round_up(tile_rows, 8)
    if _round_up(B, 8) <= tile_rows:
        tile_rows = _round_up(B, 8)          # single tile -> fused single-phase path
    num_tiles = (B + tile_rows - 1) // tile_rows
    Bp = num_tiles * tile_rows
    num_phases = 1 if num_tiles == 1 else 3
    if Bp != B:
        x = jnp.pad(x, ((0, Bp - B), (0, 0)))   # padded rows masked out of BN stats

    # ---- per-generation VMEM budget ---------------------------------------------
    est = (2 * _padded_f32_bytes(tile_rows, n_in)          # x tile (double-buffered)
           + 2 * _padded_f32_bytes(tile_rows, out_pad)     # out tile
           + 2 * (_padded_f32_bytes(*w1p.shape) + _padded_f32_bytes(*b12.shape)
                  + _padded_f32_bytes(*w2p.shape) + _padded_f32_bytes(*w3p.shape)
                  + _padded_f32_bytes(*b3p.shape))         # grid-resident weights
           + 2 * _padded_f32_bytes(2, hp)                  # stats scratch
           + 5 * _padded_f32_bytes(tile_rows, hp)          # live hidden activations
           + _padded_f32_bytes(tile_rows, out_pad))
    cap = int(_vmem_capacity_bytes() * 0.78)               # ~50 MiB v7x, ~100 MiB v5e/v6e
    vmem_limit = int(min(max(int(est * 1.35), 32 << 20), cap))

    # ---- advisory cost estimate --------------------------------------------------
    f1 = 2 * Bp * n_in * hp
    f2 = 2 * Bp * hp * hp
    f3 = 2 * Bp * hp * out_pad
    flops = (3 * f1 + 2 * f2 + f3) if num_phases == 3 else (f1 + f2 + f3)
    bytes_accessed = (num_phases * Bp * n_in * 4 + Bp * out_pad * 4
                      + 4 * (w1p.size + b12.size + w2p.size + w3p.size + b3p.size))
    cost = pl.CostEstimate(flops=int(flops), transcendentals=int(4 * hp * num_tiles),
                           bytes_accessed=int(bytes_accessed))

    # Only advance (and hence flush) the output block index in the final phase so
    # phases 0/1 never write garbage back to HBM.
    if num_phases == 1:
        out_index_map = lambda p, t: (t, 0)
    else:
        last = num_phases - 1
        out_index_map = lambda p, t: (t * (p // last), 0)

    kernel = functools.partial(_shallow_decoder_kernel, batch=B,
                               tile_rows=tile_rows, num_phases=num_phases)

    grid_spec = pltpu.PrefetchScalarGridSpec(
        num_scalar_prefetch=0,
        grid=(num_phases, num_tiles),
        in_specs=[
            pl.BlockSpec((tile_rows, n_in), lambda p, t: (t, 0)),   # x: batch-tiled
            pl.BlockSpec(w1p.shape, lambda p, t: (0, 0)),           # weights: resident
            pl.BlockSpec(b12.shape, lambda p, t: (0, 0)),
            pl.BlockSpec(w2p.shape, lambda p, t: (0, 0)),
            pl.BlockSpec(w3p.shape, lambda p, t: (0, 0)),
            pl.BlockSpec(b3p.shape, lambda p, t: (0, 0)),
        ],
        out_specs=pl.BlockSpec((tile_rows, out_pad), out_index_map),
        scratch_shapes=[pltpu.VMEM((2, hp), jnp.float32),           # layer-1 sum/sumsq
                        pltpu.VMEM((2, hp), jnp.float32)],          # layer-2 sum/sumsq
    )

    out = pl.pallas_call(
        kernel,
        out_shape=jax.ShapeDtypeStruct((Bp, out_pad), jnp.float32),
        grid_spec=grid_spec,
        compiler_params=pltpu.CompilerParams(
            # Phases are ordered and the tile axis accumulates BN stats into a
            # shared scratch, so both axes stay sequential on one core.
            # TODO(synk): v7x dual-TC: shard the tile axis across cores with a
            # CMEM + core_barrier reduction of the BN statistics.
            dimension_semantics=("arbitrary", "arbitrary"),
            vmem_limit_bytes=vmem_limit),
        cost_estimate=cost,
    )(x, w1p, b12, w2p, w3p, b3p)

    # Trim padding only when present; callers that can consume the lane-padded
    # layout may skip this slice entirely.
    if Bp != B:
        out = out[:B]
    if out_pad != out_dim:
        out = out[:, :out_dim]
    return out


# ----------------------------------------------------------------------------- params / reference
def _xavier_normal(key, fan_in, fan_out):
    # PyTorch xavier_normal_ on a (out, in) weight: std = sqrt(2 / (in + out)).
    std = (2.0 / (fan_in + fan_out)) ** 0.5
    # Sample directly as (in, out) = W^T, which is what the kernel consumes.
    return std * jax.random.normal(key, (fan_in, fan_out), dtype=jnp.float32)


def init_params(key, n_sensors, outputlayer_size):
    # PyTorch default init would give bias=0, gamma=1, beta=0; we randomize them
    # (as a trained model would have) to exercise the BN-affine fold end-to-end.
    ks = jax.random.split(key, 9)
    h1, h2 = 55, 65
    w1 = _xavier_normal(ks[0], n_sensors, h1)
    b1 = 0.1 * jax.random.normal(ks[3], (1, h1), jnp.float32)
    g1 = 1.0 + 0.1 * jax.random.normal(ks[4], (1, h1), jnp.float32)
    be1 = 0.1 * jax.random.normal(ks[5], (1, h1), jnp.float32)

    w2 = _xavier_normal(ks[1], h1, h2)
    b2 = 0.1 * jax.random.normal(ks[6], (1, h2), jnp.float32)
    g2 = 1.0 + 0.1 * jax.random.normal(ks[7], (1, h2), jnp.float32)
    be2 = 0.1 * jax.random.normal(ks[8], (1, h2), jnp.float32)

    w3 = _xavier_normal(ks[2], h2, outputlayer_size)
    b3 = jnp.zeros((1, outputlayer_size), jnp.float32)
    return (w1, b1, g1, be1, w2, b2, g2, be2, w3, b3)


def reference(x, params):
    """Pure-JAX replica of the PyTorch module's training-mode forward."""
    w1, b1, g1, be1, w2, b2, g2, be2, w3, b3 = params

    def bn(h, g, be):
        mu = h.mean(0, keepdims=True)
        var = ((h - mu) ** 2).mean(0, keepdims=True)   # biased, like PyTorch BN
        return (h - mu) / jnp.sqrt(var + EPS) * g + be

    h = jnp.maximum(x @ w1 + b1, 0.0)
    h = bn(h, g1, be1)
    h = jnp.maximum(h @ w2 + b2, 0.0)
    h = bn(h, g2, be2)
    return h @ w3 + b3


if __name__ == "__main__":
    key = jax.random.PRNGKey(0)
    k_x1, k_x2, k_p1, k_p2 = jax.random.split(key, 4)

    # ---- Case 1: whole batch in one tile (fused single-phase path) ----
    batch, n_sensors, out_size = 8, 32, 128
    x1 = jax.random.normal(k_x1, (batch, n_sensors), dtype=jnp.float32)
    raw1 = init_params(k_p1, n_sensors, out_size)
    out1 = jax.block_until_ready(shallow_decoder(x1, prepare_params(raw1), out_dim=out_size))
    ref1 = reference(x1, raw1)
    assert out1.shape == (batch, out_size)
    err1 = float(jnp.max(jnp.abs(out1 - ref1)))
    assert jnp.allclose(out1, ref1, atol=5e-4, rtol=5e-3), err1

    # ---- Case 2: batch-tiled 3-phase path (padded batch + padded output dim) ----
    batch2, n_sensors2, out_size2 = 300, 32, 200
    x2 = jax.random.normal(k_x2, (batch2, n_sensors2), dtype=jnp.float32)
    raw2 = init_params(k_p2, n_sensors2, out_size2)
    out2 = jax.block_until_ready(
        shallow_decoder(x2, prepare_params(raw2), out_dim=out_size2, tile_rows=128))
    ref2 = reference(x2, raw2)
    assert out2.shape == (batch2, out_size2)
    err2 = float(jnp.max(jnp.abs(out2 - ref2)))
    assert jnp.allclose(out2, ref2, atol=5e-4, rtol=5e-3), err2

    print("KERNEL_OK")
</pallas_src>

<mosaic_0001>
module attributes {stable_mosaic.version = 11 : i64} {
  func.func @_shallow_decoder_kernel(%arg0: i32, %arg1: i32, %arg2: memref<8x32xf32, #tpu.memory_space<vmem>>, %arg3: memref<32x128xf32, #tpu.memory_space<vmem>>, %arg4: memref<2x128xf32, #tpu.memory_space<vmem>>, %arg5: memref<128x128xf32, #tpu.memory_space<vmem>>, %arg6: memref<128x128xf32, #tpu.memory_space<vmem>>, %arg7: memref<1x128xf32, #tpu.memory_space<vmem>>, %arg8: memref<8x128xf32, #tpu.memory_space<vmem>>, %arg9: memref<2x128xf32, #tpu.memory_space<vmem>>, %arg10: memref<2x128xf32, #tpu.memory_space<vmem>>) attributes {dimension_semantics = [#tpu.dimension_semantics<arbitrary>, #tpu.dimension_semantics<arbitrary>], iteration_bounds = array<i64: 1, 1>, scalar_prefetch = 0 : i64, scratch_operands = 2 : i64, tpu.core_type = #tpu.core_type<tc>, window_params = [{transform_indices = @transform_0, window_bounds = array<i64: 8, 32>}, {pipeline_mode = #tpu.pipeline_mode<synchronous>, transform_indices = @transform_1, window_bounds = array<i64: 32, 128>}, {pipeline_mode = #tpu.pipeline_mode<synchronous>, transform_indices = @transform_2, window_bounds = array<i64: 2, 128>}, {pipeline_mode = #tpu.pipeline_mode<synchronous>, transform_indices = @transform_3, window_bounds = array<i64: 128, 128>}, {pipeline_mode = #tpu.pipeline_mode<synchronous>, transform_indices = @transform_4, window_bounds = array<i64: 128, 128>}, {pipeline_mode = #tpu.pipeline_mode<synchronous>, transform_indices = @transform_5, window_bounds = array<i64: 1, 128>}, {transform_indices = @transform_6, window_bounds = array<i64: 8, 128>}]} {
    %0 = tpu.iota {dimensions = array<i32: 0>} : vector<8x1xi32>
    %c8_i32 = arith.constant 8 : i32
    %1 = arith.muli %arg1, %c8_i32 : i32
    %2 = vector.broadcast %1 : i32 to vector<8x1xi32>
    %3 = arith.addi %2, %0 : vector<8x1xi32>
    %c8_i32_0 = arith.constant 8 : i32
    %4 = vector.broadcast %c8_i32_0 : i32 to vector<8x1xi32>
    %5 = arith.cmpi slt, %3, %4 : vector<8x1xi32>
    %c0 = arith.constant 0 : index
    %c0_1 = arith.constant 0 : index
    %6 = vector.load %arg2[%c0, %c0_1] : memref<8x32xf32, #tpu.memory_space<vmem>>, vector<8x32xf32>
    %c0_2 = arith.constant 0 : index
    %c0_3 = arith.constant 0 : index
    %7 = vector.load %arg3[%c0_2, %c0_3] : memref<32x128xf32, #tpu.memory_space<vmem>>, vector<32x128xf32>
    %cst = arith.constant dense<0.000000e+00> : vector<8x128xf32>
    %8 = tpu.matmul %6, %7, %cst {dimension_numbers = #tpu.dot_dimension_numbers<[1], [0], [0], [1], [0, 0, 1, 1], [], []>} : vector<8x32xf32>, vector<32x128xf32>, vector<8x128xf32> -> vector<8x128xf32>
    %c0_4 = arith.constant 0 : index
    %c0_5 = arith.constant 0 : index
    %9 = vector.load %arg4[%c0_4, %c0_5] : memref<2x128xf32, #tpu.memory_space<vmem>>, vector<1x128xf32>
    %10 = vector.broadcast %9 : vector<1x128xf32> to vector<8x128xf32>
    %11 = arith.addf %8, %10 : vector<8x128xf32>
    %cst_6 = arith.constant 0.000000e+00 : f32
    %12 = vector.broadcast %cst_6 : f32 to vector<8x128xf32>
    %13 = arith.maximumf %11, %12 : vector<8x128xf32>
    %cst_7 = arith.constant 0.000000e+00 : f32
    %14 = vector.shape_cast %5 : vector<8x1xi1> to vector<8x1xi1>
    %15 = vector.broadcast %14 : vector<8x1xi1> to vector<8x128xi1>
    %16 = vector.broadcast %cst_7 : f32 to vector<8x128xf32>
    %17 = arith.select %15, %13, %16 : vector<8x128xi1>, vector<8x128xf32>
    %cst_8 = arith.constant dense<0.000000e+00> : vector<128xf32>
    %18 = vector.multi_reduction <add>, %17, %cst_8 [0] : vector<8x128xf32> to vector<128xf32>
    %19 = vector.shape_cast %18 : vector<128xf32> to vector<1x128xf32>
    %cst_9 = arith.constant 1.250000e-01 : f32
    %20 = vector.broadcast %cst_9 : f32 to vector<1x128xf32>
    %21 = arith.mulf %19, %20 : vector<1x128xf32>
    %22 = vector.broadcast %21 : vector<1x128xf32> to vector<8x128xf32>
    %23 = arith.subf %13, %22 : vector<8x128xf32>
    %24 = arith.mulf %23, %23 : vector<8x128xf32>
    %cst_10 = arith.constant 0.000000e+00 : f32
    %25 = vector.shape_cast %5 : vector<8x1xi1> to vector<8x1xi1>
    %26 = vector.broadcast %25 : vector<8x1xi1> to vector<8x128xi1>
    %27 = vector.broadcast %cst_10 : f32 to vector<8x128xf32>
    %28 = arith.select %26, %24, %27 : vector<8x128xi1>, vector<8x128xf32>
    %cst_11 = arith.constant dense<0.000000e+00> : vector<128xf32>
    %29 = vector.multi_reduction <add>, %28, %cst_11 [0] : vector<8x128xf32> to vector<128xf32>
    %30 = vector.shape_cast %29 : vector<128xf32> to vector<1x128xf32>
    %cst_12 = arith.constant 1.250000e-01 : f32
    %31 = vector.broadcast %cst_12 : f32 to vector<1x128xf32>
    %32 = arith.mulf %30, %31 : vector<1x128xf32>
    %33 = vector.broadcast %21 : vector<1x128xf32> to vector<8x128xf32>
    %34 = arith.subf %13, %33 : vector<8x128xf32>
    %cst_13 = arith.constant 9.99999974E-6 : f32
    %35 = vector.broadcast %cst_13 : f32 to vector<1x128xf32>
    %36 = arith.addf %32, %35 : vector<1x128xf32>
    %37 = math.rsqrt %36 : vector<1x128xf32>
    %38 = vector.broadcast %37 : vector<1x128xf32> to vector<8x128xf32>
    %39 = arith.mulf %34, %38 : vector<8x128xf32>
    %c0_14 = arith.constant 0 : index
    %c0_15 = arith.constant 0 : index
    %40 = vector.load %arg5[%c0_14, %c0_15] : memref<128x128xf32, #tpu.memory_space<vmem>>, vector<128x128xf32>
    %cst_16 = arith.constant dense<0.000000e+00> : vector<8x128xf32>
    %41 = tpu.matmul %39, %40, %cst_16 {dimension_numbers = #tpu.dot_dimension_numbers<[1], [0], [0], [1], [0, 0, 1, 1], [], []>} : vector<8x128xf32>, vector<128x128xf32>, vector<8x128xf32> -> vector<8x128xf32>
    %c1 = arith.constant 1 : index
    %c0_17 = arith.constant 0 : index
    %42 = vector.load %arg4[%c1, %c0_17] : memref<2x128xf32, #tpu.memory_space<vmem>>, vector<1x128xf32>
    %43 = vector.broadcast %42 : vector<1x128xf32> to vector<8x128xf32>
    %44 = arith.addf %41, %43 : vector<8x128xf32>
    %cst_18 = arith.constant 0.000000e+00 : f32
    %45 = vector.broadcast %cst_18 : f32 to vector<8x128xf32>
    %46 = arith.maximumf %44, %45 : vector<8x128xf32>
    %cst_19 = arith.constant 0.000000e+00 : f32
    %47 = vector.shape_cast %5 : vector<8x1xi1> to vector<8x1xi1>
    %48 = vector.broadcast %47 : vector<8x1xi1> to vector<8x128xi1>
    %49 = vector.broadcast %cst_19 : f32 to vector<8x128xf32>
    %50 = arith.select %48, %46, %49 : vector<8x128xi1>, vector<8x128xf32>
    %cst_20 = arith.constant dense<0.000000e+00> : vector<128xf32>
    %51 = vector.multi_reduction <add>, %50, %cst_20 [0] : vector<8x128xf32> to vector<128xf32>
    %52 = vector.shape_cast %51 : vector<128xf32> to vector<1x128xf32>
    %cst_21 = arith.constant 1.250000e-01 : f32
    %53 = vector.broadcast %cst_21 : f32 to vector<1x128xf32>
    %54 = arith.mulf %52, %53 : vector<1x128xf32>
    %55 = vector.broadcast %54 : vector<1x128xf32> to vector<8x128xf32>
    %56 = arith.subf %46, %55 : vector<8x128xf32>
    %57 = arith.mulf %56, %56 : vector<8x128xf32>
    %cst_22 = arith.constant 0.000000e+00 : f32
    %58 = vector.shape_cast %5 : vector<8x1xi1> to vector<8x1xi1>
    %59 = vector.broadcast %58 : vector<8x1xi1> to vector<8x128xi1>
    %60 = vector.broadcast %cst_22 : f32 to vector<8x128xf32>
    %61 = arith.select %59, %57, %60 : vector<8x128xi1>, vector<8x128xf32>
    %cst_23 = arith.constant dense<0.000000e+00> : vector<128xf32>
    %62 = vector.multi_reduction <add>, %61, %cst_23 [0] : vector<8x128xf32> to vector<128xf32>
    %63 = vector.shape_cast %62 : vector<128xf32> to vector<1x128xf32>
    %cst_24 = arith.constant 1.250000e-01 : f32
    %64 = vector.broadcast %cst_24 : f32 to vector<1x128xf32>
    %65 = arith.mulf %63, %64 : vector<1x128xf32>
    %66 = vector.broadcast %54 : vector<1x128xf32> to vector<8x128xf32>
    %67 = arith.subf %46, %66 : vector<8x128xf32>
    %cst_25 = arith.constant 9.99999974E-6 : f32
    %68 = vector.broadcast %cst_25 : f32 to vector<1x128xf32>
    %69 = arith.addf %65, %68 : vector<1x128xf32>
    %70 = math.rsqrt %69 : vector<1x128xf32>
    %71 = vector.broadcast %70 : vector<1x128xf32> to vector<8x128xf32>
    %72 = arith.mulf %67, %71 : vector<8x128xf32>
    %c0_26 = arith.constant 0 : index
    %c0_27 = arith.constant 0 : index
    %73 = vector.load %arg6[%c0_26, %c0_27] : memref<128x128xf32, #tpu.memory_space<vmem>>, vector<128x128xf32>
    %cst_28 = arith.constant dense<0.000000e+00> : vector<8x128xf32>
    %74 = tpu.matmul %72, %73, %cst_28 {dimension_numbers = #tpu.dot_dimension_numbers<[1], [0], [0], [1], [0, 0, 1, 1], [], []>} : vector<8x128xf32>, vector<128x128xf32>, vector<8x128xf32> -> vector<8x128xf32>
    %c0_29 = arith.constant 0 : index
    %c0_30 = arith.constant 0 : index
    %75 = vector.load %arg7[%c0_29, %c0_30] : memref<1x128xf32, #tpu.memory_space<vmem>>, vector<1x128xf32>
    %76 = vector.broadcast %75 : vector<1x128xf32> to vector<8x128xf32>
    %77 = arith.addf %74, %76 : vector<8x128xf32>
    %c0_31 = arith.constant 0 : index
    %c0_32 = arith.constant 0 : index
    %78 = vector.load %arg8[%c0_31, %c0_32] : memref<8x128xf32, #tpu.memory_space<vmem>>, vector<8x128xf32>
    tpu.vector_store %arg8[%c0_31, %c0_32], %77 {strides = array<i32>} : memref<8x128xf32, #tpu.memory_space<vmem>>, vector<8x128xf32>,
    return
  }
  func.func @transform_0(%arg0: i32, %arg1: i32) -> (i32, i32) {
    %c0_i32 = arith.constant 0 : i32
    %c0_i32_0 = arith.constant 0 : i32
    return %arg1, %c0_i32 : i32, i32
  }
  func.func @transform_1(%arg0: i32, %arg1: i32) -> (i32, i32) {
    %c0_i32 = arith.constant 0 : i32
    %c0_i32_0 = arith.constant 0 : i32
    %c0_i32_1 = arith.constant 0 : i32
    return %c0_i32, %c0_i32_0 : i32, i32
  }
  func.func @transform_2(%arg0: i32, %arg1: i32) -> (i32, i32) {
    %c0_i32 = arith.constant 0 : i32
    %c0_i32_0 = arith.constant 0 : i32
    %c0_i32_1 = arith.constant 0 : i32
    return %c0_i32, %c0_i32_0 : i32, i32
  }
  func.func @transform_3(%arg0: i32, %arg1: i32) -> (i32, i32) {
    %c0_i32 = arith.constant 0 : i32
    %c0_i32_0 = arith.constant 0 : i32
    %c0_i32_1 = arith.constant 0 : i32
    return %c0_i32, %c0_i32_0 : i32, i32
  }
  func.func @transform_4(%arg0: i32, %arg1: i32) -> (i32, i32) {
    %c0_i32 = arith.constant 0 : i32
    %c0_i32_0 = arith.constant 0 : i32
    %c0_i32_1 = arith.constant 0 : i32
    return %c0_i32, %c0_i32_0 : i32, i32
  }
  func.func @transform_5(%arg0: i32, %arg1: i32) -> (i32, i32) {
    %c0_i32 = arith.constant 0 : i32
    %c0_i32_0 = arith.constant 0 : i32
    %c0_i32_1 = arith.constant 0 : i32
    return %c0_i32, %c0_i32_0 : i32, i32
  }
  func.func @transform_6(%arg0: i32, %arg1: i32) -> (i32, i32) {
    %c0_i32 = arith.constant 0 : i32
    %c0_i32_0 = arith.constant 0 : i32
    return %arg1, %c0_i32 : i32, i32
  }
}

</mosaic_0001>

<bundles_post_ra>
// kernel: shallow_decoder.1
= control target key start
LH: loop header
LB: loop body
LE: loop exit
PB: predicated region body
PF: predicated region fallthrough
CT: control target
= control target key end

     0   :  { %11 = vsyncpa [#allocation5], 0  ;;  %s779_s0 = inlined_call_operand.hbm [shape: f32[8,32], index: 0, kind: input, shape index: {}]   ;;  %s780_s1 = inlined_call_operand.hbm [shape: f32[32,128], index: 1, kind: input, shape index: {}]   ;;  %s781_s2 = inlined_call_operand.vmem [shape: f32[2,128], index: 2, kind: input, shape index: {}]   ;;  %s782_s3 = inlined_call_operand.hbm [shape: f32[128,128], index: 3, kind: input, shape index: {}]   ;;  %s783_s4 = inlined_call_operand.hbm [shape: f32[128,128], index: 4, kind: input, shape index: {}]   ;;  %s784_s5 = inlined_call_operand.vmem [shape: f32[1,128], index: 5, kind: input, shape index: {}]   ;;  %s785_s6 = inlined_call_operand.hbm [shape: f32[8,128], index: 6, kind: output, shape index: {}]  }
   0x1   :  { %12 = vsyncpa [#allocation8], 0 }
   0x2   :  { %13 = vsyncpa [#allocation11], 0 }
   0x3   :  { %14 = vsyncpa [#allocation6], 0  ;;  %s660_s21 = smov [#allocation7]  }
   0x4   :  { %s30_s22 = sshll.u32 %s660_s21, 4  ;;  %s31_s22 = int_to_ptr.vmem [resolvable:$true] %s30_s22 }
   0x5   :  { %s560_s23 = scalar_lea.vmem %s31_s22, 512  ;;  %p565_p1 = scmp.lt.s32.totalorder %s31_s22, %s31_s22 }
   0x6   :  { %p561_p0 = scmp.ne.s32.totalorder %s31_s22, %s560_s23  ;;  %p566_p2 = scmp.lt.s32.totalorder %s560_s23, %s560_s23 }
   0x8   :  { %p567_p3 = por %p566_p2, %p565_p1 }
   0xa   :  { %p568_p4 = pnand %p567_p3, %p561_p0 }
   0xc   :  { %571 = shalt.err (!%p568_p4)
}
   0xd   :  { %s661_s24 = smov 128   ;;  %s662_s25 = smov 8  }
   0xe   :  { %36 = dma.hbm_to_vmem [thread:$0]  %s780_s1, 512, %s31_s22, [#allocation8], %s661_s24, %s661_s24, %s662_s25  }
   0xf   :  { %s663_s28 = smov [#allocation4]   ;;  %s664_s30 = smov [#allocation9]  }
  0x10   :  { %s21_s29 = sshll.u32 %s663_s28, 4  ;;  %s44_s7 = sshll.u32 %s664_s30, 4  ;;  %s22_s29 = int_to_ptr.vmem [resolvable:$true] %s21_s29  ;;  %s45_s7 = int_to_ptr.vmem [resolvable:$true] %s44_s7 }
  0x11   :  { %s580_s8 = scalar_lea.vmem %s22_s29, 128  ;;  %p585_p6 = scmp.lt.s32.totalorder %s22_s29, %s22_s29 }
  0x12   :  { %p581_p5 = scmp.ne.s32.totalorder %s22_s29, %s580_s8  ;;  %p586_p7 = scmp.lt.s32.totalorder %s580_s8, %s580_s8 }
  0x14   :  { %p587_p8 = por %p586_p7, %p585_p6 }
  0x16   :  { %p588_p9 = pnand %p587_p8, %p581_p5 }
  0x18   :  { %591 = shalt.err (!%p588_p9)
}
  0x19   :  { %24 = dma.hbm_to_vmem [thread:$0]  %s779_s0, 128, %s22_s29, [#allocation5]  }
  0x1a   :  { %s600_s11 = scalar_lea.vmem %s45_s7, 2048  ;;  %p605_p11 = scmp.lt.s32.totalorder %s45_s7, %s45_s7 }
  0x1b   :  { %p601_p10 = scmp.ne.s32.totalorder %s45_s7, %s600_s11  ;;  %p606_p12 = scmp.lt.s32.totalorder %s600_s11, %s600_s11 }
  0x1d   :  { %p607_p13 = por %p606_p12, %p605_p11 }
  0x1f   :  { %p608_p0 = pnand %p607_p13, %p601_p10 }
  0x21   :  { %611 = shalt.err (!%p608_p0)
}
  0x22   :  { %50 = dma.hbm_to_vmem [thread:$0]  %s782_s3, 2048, %s45_s7, [#allocation8], %s661_s24, %s661_s24, %s662_s25  }
  0x23   :  { %s665_s13 = smov [#allocation10]  }
  0x24   :  { %s56_s14 = sshll.u32 %s665_s13, 4  ;;  %s57_s14 = int_to_ptr.vmem [resolvable:$true] %s56_s14 }
  0x25   :  { %s620_s15 = scalar_lea.vmem %s57_s14, 2048  ;;  %p625_p2 = scmp.lt.s32.totalorder %s57_s14, %s57_s14 }
  0x26   :  { %p621_p1 = scmp.ne.s32.totalorder %s57_s14, %s620_s15  ;;  %p626_p3 = scmp.lt.s32.totalorder %s620_s15, %s620_s15 }
  0x28   :  { %p627_p4 = por %p626_p3, %p625_p2 }
  0x2a   :  { %p628_p5 = pnand %p627_p4, %p621_p1 }
  0x2c   :  { %631 = shalt.err (!%p628_p5)
}
  0x2d   :  { %62 = dma.hbm_to_vmem [thread:$0]  %s783_s4, 2048, %s57_s14, [#allocation11], %s661_s24, %s661_s24, %s662_s25  }
  0x2e   :  { %652 = dma.done.wait [#allocation5], 128  }
  0x2f   :  { %653 = vsyncadd [#allocation5], 4294967168 }
  0x30   :  { %654 = dma.done.wait [#allocation8], 2560  }
  0x31   :  { %655 = vsyncadd [#allocation8], 4294964736 }
  0x32   :  { %656 = dma.done.wait [#allocation11], 2048  }
  0x33   :  { %657 = vsyncadd [#allocation11], 4294965248  ;;  %v666_v0 = vmov 0.0   ;;  %vm667_vm0 = vmmov 0   ;;  %v87_v1 = vld [vmem:[#allocation7 + $0x18] sm:$0xff]  ;;  %v86_v2 = vld [vmem:[#allocation7 + $0x10] sm:$0xff] }
  0x34   :  { %458 = vmatprep.subr.mxu0 %v666_v0  ;;  %466 = vmatprep.mubr.msk.f32.mxu0 %vm667_vm0, %v666_v0  ;;  %v85_v3 = vld [vmem:[#allocation7 + $0x8] sm:$0xff]  ;;  %v84_v4 = vld [vmem:[#allocation7] sm:$0xff]  ;;  %v83_v5 = vld [vmem:[#allocation4] sm:$0xff]  ;;  %vm93_vm1 = vcmask 261120   ;;  %s668_s20 = smov [#allocation12]  }
  0x35   :  { %469 = vmatprep.subr.mxu1 %v666_v0  ;;  %501 = vmatprep.mubr.msk.f32.mxu1 %vm667_vm0, %v666_v0  ;;  %v206_v6 = vld [vmem:[#allocation9 + $0x78] sm:$0xff]  ;;  %v205_v7 = vld [vmem:[#allocation9 + $0x70] sm:$0xff]  ;;  %v204_v8 = vld [vmem:[#allocation9 + $0x68] sm:$0xff]  ;;  %s404_s21 = sshll.u32 %s668_s20, 4  ;;  %s405_s21 = int_to_ptr.vmem [resolvable:$true] %s404_s21 }
  0x36   :  { %459 = vmatpush3.msra.mxu0 %v87_v1  ;;  %470 = vmatpush3.msra.mxu1 %v206_v6  ;;  %v203_v9 = vld [vmem:[#allocation9 + $0x60] sm:$0xff]  ;;  %v202_v10 = vld [vmem:[#allocation9 + $0x58] sm:$0xff]  ;;  %v201_v11 = vld [vmem:[#allocation9 + $0x50] sm:$0xff]  ;;  %s632_s22 = scalar_lea.vmem %s405_s21, 128  ;;  %p637_p7 = scmp.lt.s32.totalorder %s405_s21, %s405_s21 }
  0x37   :  { %460 = vmatprep.subr.mxu0 %v666_v0  ;;  %471 = vmatprep.subr.mxu1 %v666_v0  ;;  %v200_v12 = vld [vmem:[#allocation9 + $0x48] sm:$0xff]  ;;  %v199_v13 = vld [vmem:[#allocation9 + $0x40] sm:$0xff]  ;;  %v198_v14 = vld [vmem:[#allocation9 + $0x38] sm:$0xff]  ;;  %p633_p6 = scmp.ne.s32.totalorder %s405_s21, %s632_s22  ;;  %p638_p8 = scmp.lt.s32.totalorder %s632_s22, %s632_s22 }
  0x38   :  { %461 = vmatpush3.msra.mxu0 %v86_v2  ;;  %472 = vmatpush3.msra.mxu1 %v205_v7  ;;  %v197_v15 = vld [vmem:[#allocation9 + $0x30] sm:$0xff]  ;;  %v196_v16 = vld [vmem:[#allocation9 + $0x28] sm:$0xff]  ;;  %v195_v17 = vld [vmem:[#allocation9 + $0x20] sm:$0xff] }
  0x39   :  { %462 = vmatprep.subr.mxu0 %v666_v0  ;;  %473 = vmatprep.subr.mxu1 %v666_v0  ;;  %v194_v18 = vld [vmem:[#allocation9 + $0x18] sm:$0xff]  ;;  %v193_v19 = vld [vmem:[#allocation9 + $0x10] sm:$0xff]  ;;  %v192_v20 = vld [vmem:[#allocation9 + $0x8] sm:$0xff]  ;;  %p639_p9 = por %p638_p8, %p637_p7 }
  0x3a   :  { %463 = vmatpush3.msra.mxu0 %v85_v3  ;;  %474 = vmatpush3.msra.mxu1 %v204_v8  ;;  %v191_v21 = vld [vmem:[#allocation9] sm:$0xff]  ;;  %v415_v22 = vld [vmem:[%s781_s2] ss:$0 sm:$0xff]  ;;  %v318_v47 = vld [vmem:[#allocation10 + $0x70] sm:$0xff] }
  0x3b   :  { %464 = vmatprep.subr.mxu0 %v666_v0  ;;  %475 = vmatprep.subr.mxu1 %v666_v0  ;;  %v319_v46 = vld [vmem:[#allocation10 + $0x78] sm:$0xff]  ;;  %v317_v48 = vld [vmem:[#allocation10 + $0x68] sm:$0xff]  ;;  %v316_v49 = vld [vmem:[#allocation10 + $0x60] sm:$0xff]  ;;  %p640_p10 = pnand %p639_p9, %p633_p6 }
  0x3c   :  { %465 = vmatpush3.msra.mxu0 %v84_v4  ;;  %476 = vmatpush3.msra.mxu1 %v203_v9  ;;  %v315_v50 = vld [vmem:[#allocation10 + $0x58] sm:$0xff]  ;;  %v314_v51 = vld [vmem:[#allocation10 + $0x50] sm:$0xff]  ;;  %v313_v52 = vld [vmem:[#allocation10 + $0x48] sm:$0xff] }
  0x3d   :  { %467 = vmatmul.mubr.msk.f32.vlgmr.msra.gmra.mxu0 %vm93_vm1, %v83_v5  ;;  %504 = vmatprep.subr.mxu0 %v666_v0  ;;  %v312_v53 = vld [vmem:[#allocation10 + $0x40] sm:$0xff]  ;;  %v311_v54 = vld [vmem:[#allocation10 + $0x38] sm:$0xff]  ;;  %v310_v55 = vld [vmem:[#allocation10 + $0x30] sm:$0xff] }
  0x3e   :  { %536 = vmatprep.mubr.msk.f32.mxu0 %vm667_vm0, %v666_v0  ;;  %477 = vmatprep.subr.mxu1 %v666_v0  ;;  %v309_v56 = vld [vmem:[#allocation10 + $0x28] sm:$0xff]  ;;  %v308_v57 = vld [vmem:[#allocation10 + $0x20] sm:$0xff]  ;;  %v307_v58 = vld [vmem:[#allocation10 + $0x18] sm:$0xff] }
  0x3f   :  { %478 = vmatpush3.msra.mxu1 %v202_v10  ;;  %505 = vmatpush3.msra.mxu0 %v319_v46  ;;  %v306_v59 = vld [vmem:[#allocation10 + $0x10] sm:$0xff]  ;;  %v305_v60 = vld [vmem:[#allocation10 + $0x8] sm:$0xff]  ;;  %v304_v61 = vld [vmem:[#allocation10] sm:$0xff] }
  0x40   :  { %479 = vmatprep.subr.mxu1 %v666_v0  ;;  %506 = vmatprep.subr.mxu0 %v666_v0  ;;  %v417_v62 = vld [vmem:[%s781_s2 + $0x1] ss:$0 sm:$0xff] }
  0x41   :  { %480 = vmatpush3.msra.mxu1 %v201_v11  ;;  %507 = vmatpush3.msra.mxu0 %v318_v47 }
  0x42   :  { %481 = vmatprep.subr.mxu1 %v666_v0  ;;  %508 = vmatprep.subr.mxu0 %v666_v0 }
  0x43   :  { %482 = vmatpush3.msra.mxu1 %v200_v12  ;;  %509 = vmatpush3.msra.mxu0 %v317_v48 }
  0x44   :  { %483 = vmatprep.subr.mxu1 %v666_v0  ;;  %510 = vmatprep.subr.mxu0 %v666_v0 }
  0x45   :  { %484 = vmatpush3.msra.mxu1 %v199_v13  ;;  %511 = vmatpush3.msra.mxu0 %v316_v49 }
  0x46   :  { %485 = vmatprep.subr.mxu1 %v666_v0  ;;  %512 = vmatprep.subr.mxu0 %v666_v0 }
  0x47   :  { %486 = vmatpush3.msra.mxu1 %v198_v14  ;;  %513 = vmatpush3.msra.mxu0 %v315_v50 }
  0x48   :  { %487 = vmatprep.subr.mxu1 %v666_v0  ;;  %514 = vmatprep.subr.mxu0 %v666_v0 }
  0x49   :  { %488 = vmatpush3.msra.mxu1 %v197_v15  ;;  %515 = vmatpush3.msra.mxu0 %v314_v51 }
  0x4a   :  { %489 = vmatprep.subr.mxu1 %v666_v0  ;;  %516 = vmatprep.subr.mxu0 %v666_v0 }
  0x4b   :  { %490 = vmatpush3.msra.mxu1 %v196_v16  ;;  %517 = vmatpush3.msra.mxu0 %v313_v52 }
  0x4c   :  { %491 = vmatprep.subr.mxu1 %v666_v0  ;;  %518 = vmatprep.subr.mxu0 %v666_v0 }
  0x4d   :  { %492 = vmatpush3.msra.mxu1 %v195_v17  ;;  %519 = vmatpush3.msra.mxu0 %v312_v53 }
  0x4e   :  { %493 = vmatprep.subr.mxu1 %v666_v0  ;;  %520 = vmatprep.subr.mxu0 %v666_v0 }
  0x4f   :  { %494 = vmatpush3.msra.mxu1 %v194_v18  ;;  %521 = vmatpush3.msra.mxu0 %v311_v54 }
  0x50   :  { %495 = vmatprep.subr.mxu1 %v666_v0  ;;  %522 = vmatprep.subr.mxu0 %v666_v0 }
  0x51   :  { %496 = vmatpush3.msra.mxu1 %v193_v19  ;;  %523 = vmatpush3.msra.mxu0 %v310_v55 }
  0x52   :  { %497 = vmatprep.subr.mxu1 %v666_v0  ;;  %524 = vmatprep.subr.mxu0 %v666_v0 }
  0x53   :  { %498 = vmatpush3.msra.mxu1 %v192_v20  ;;  %525 = vmatpush3.msra.mxu0 %v309_v56 }
  0x54   :  { %499 = vmatprep.subr.mxu1 %v666_v0  ;;  %526 = vmatprep.subr.mxu0 %v666_v0 }
  0x55   :  { %500 = vmatpush3.msra.mxu1 %v191_v21  ;;  %527 = vmatpush3.msra.mxu0 %v308_v57 }
  0x56   :  { %528 = vmatprep.subr.mxu0 %v666_v0 }
  0x57   :  { %529 = vmatpush3.msra.mxu0 %v307_v58 }
  0x58   :  { %530 = vmatprep.subr.mxu0 %v666_v0 }
  0x59   :  { %531 = vmatpush3.msra.mxu0 %v306_v59 }
  0x5a   :  { %532 = vmatprep.subr.mxu0 %v666_v0 }
  0x5b   :  { %533 = vmatpush3.msra.mxu0 %v305_v60 }
  0x5c   :  { %534 = vmatprep.subr.mxu0 %v666_v0 }
  0x5d   :  { %535 = vmatpush3.msra.mxu0 %v304_v61 }
  0xfd   :  { %v163_v23 = vpop.f32.mrf.mxu0 }
  0xfe   :  { %v164_v24 = vadd.f32 %v415_v22, %v163_v23  ;;  %v418_v22 = vld [vmem:[%s784_s5] ss:$0 sm:$0xff] }
  0xff   :  { %v468_v25 = vpop.f32.mrf.mxu0 }
 0x100   :  { %v167_v26 = vmax.f32 %v164_v24, 0.0 }
 0x102   :  { %v171_v27 = vrot.slane %v167_v26, 4 }
 0x104   :  { %v172_v28 = vadd.f32 %v171_v27, %v167_v26 }
 0x106   :  { %v173_v29 = vrot.slane %v172_v28, 2 }
 0x108   :  { %v174_v30 = vadd.f32 %v173_v29, %v172_v28 }
 0x10a   :  { %v175_v31 = vrot.slane %v174_v30, 1 }
 0x10c   :  { %v176_v32 = vadd.f32 %v175_v31, %v174_v30 }
 0x10e   :  { %v177_v33 = vmul.f32 0.125, %v176_v32 }
 0x110   :  { %v178_v34 = vsub.f32 %v167_v26, %v177_v33 }
 0x112   :  { %v179_v35 = vmul.f32 %v178_v34, %v178_v34 }
 0x114   :  { %v181_v36 = vrot.slane %v179_v35, 4 }
 0x116   :  { %v182_v37 = vadd.f32 %v181_v36, %v179_v35 }
 0x118   :  { %v183_v38 = vrot.slane %v182_v37, 2 }
 0x11a   :  { %v184_v39 = vadd.f32 %v183_v38, %v182_v37 }
 0x11c   :  { %v185_v40 = vrot.slane %v184_v39, 1 }
 0x11e   :  { %v186_v41 = vadd.f32 %v185_v40, %v184_v39 }
 0x120   :  { %v187_v42 = vmul.f32 0.125, %v186_v41 }
 0x122   :  { %v188_v43 = vadd.f32 1e-05, %v187_v42 }
 0x124   :  { %548 = vrsqrt.f32 %v188_v43 }
 0x131   :  { %v549_v44 = vpop.eup %548 }
 0x132   :  { %v190_v45 = vmul.f32 %v549_v44, %v178_v34 }
 0x134   :  { %502 = vmatmul.mubr.f32.vlgmr.msra.gmra.mxu1 %v190_v45 }
 0x1f4   :  { %v278_v63 = vpop.f32.mrf.mxu1 }
 0x1f5   :  { %v279_v1 = vadd.f32 %v417_v62, %v278_v63 }
 0x1f6   :  { %v503_v2 = vpop.f32.mrf.mxu1 }
 0x1f7   :  { %v282_v3 = vmax.f32 %v279_v1, 0.0 }
 0x1f9   :  { %v284_v4 = vrot.slane %v282_v3, 4 }
 0x1fb   :  { %v285_v5 = vadd.f32 %v284_v4, %v282_v3 }
 0x1fd   :  { %v286_v6 = vrot.slane %v285_v5, 2 }
 0x1ff   :  { %v287_v7 = vadd.f32 %v286_v6, %v285_v5 }
 0x201   :  { %v288_v8 = vrot.slane %v287_v7, 1 }
 0x203   :  { %v289_v9 = vadd.f32 %v288_v8, %v287_v7 }
 0x205   :  { %v290_v10 = vmul.f32 0.125, %v289_v9 }
 0x207   :  { %v291_v11 = vsub.f32 %v282_v3, %v290_v10 }
 0x209   :  { %v292_v12 = vmul.f32 %v291_v11, %v291_v11 }
 0x20b   :  { %v294_v13 = vrot.slane %v292_v12, 4 }
 0x20d   :  { %v295_v0 = vadd.f32 %v294_v13, %v292_v12 }
 0x20f   :  { %v296_v14 = vrot.slane %v295_v0, 2 }
 0x211   :  { %v297_v15 = vadd.f32 %v296_v14, %v295_v0 }
 0x213   :  { %v298_v16 = vrot.slane %v297_v15, 1 }
 0x215   :  { %v299_v17 = vadd.f32 %v298_v16, %v297_v15 }
 0x217   :  { %v300_v18 = vmul.f32 0.125, %v299_v17 }
 0x219   :  { %v301_v19 = vadd.f32 1e-05, %v300_v18 }
 0x21b   :  { %550 = vrsqrt.f32 %v301_v19 }
 0x228   :  { %v551_v20 = vpop.eup %550 }
 0x229   :  { %v303_v21 = vmul.f32 %v551_v20, %v291_v11 }
 0x22b   :  { %537 = vmatmul.mubr.f32.vlgmr.msra.gmra.mxu0 %v303_v21 }
 0x2eb   :  { %v393_v23 = vpop.f32.mrf.mxu0 }
 0x2ec   :  { %v394_v24 = vadd.f32 %v418_v22, %v393_v23 }
 0x2ed   :  { %v538_v25 = vpop.f32.mrf.mxu0 }
 0x2ee   :  { %397 = vst [vmem:[#allocation12] sm:$0xff] %v394_v24 }
 0x2ef   :  { %643 = shalt.err (!%p640_p10)
}
 0x2f0   :  { %407 = dma.vmem_to_hbm [thread:$0]  %s405_s21, 128, %s785_s6, [#allocation6]  }
 0x2f1   :  { %658 = dma.done.wait [#allocation6], 128  }
 0x2f2   :  { %659 = vsyncadd [#allocation6], 4294967168 }
 0x2f3   :  { %411 = vsyncpa [#allocation5], 1 }
 0x2f4   :  { %412 = vsyncpa [#allocation8], 1 }
 0x2f5   :  { %413 = vsyncpa [#allocation11], 1 }
 0x2f6   :  { %414 = vsyncpa [#allocation6], 1 }

</bundles_post_ra>
